<compile_context>
chip_gen: v7x
topology: tpu7x:2x2x1
jax: 0.10.0
libtpu: 0.0.40
codegen_flags: <defaults>
</compile_context>

<pallas_src>
import jax
import jax.numpy as jnp
import numpy as np
from jax.experimental import pallas as pl
from jax.experimental.pallas import tpu as pltpu

# ----------------------------- static config -----------------------------
K = 2
IN_CH = 8
HID = 32
OUT_CH = 4
OUT_PAD = 128           # lane-dense padded output width
NB = 2 * K + 1          # 5 propagation stacks: [x, L_1..L_K, H_1..H_K]
FINAL_NZ = K + 1        # A_embed=False
OUT_NORM = True
EPS = 1e-12             # F.normalize eps


# ------------------------------- kernel ----------------------------------
def lsgnn_kernel(
    xcat_ref,                       # [N, NB*IN_CH]   f32  (lane-dense stacks)
    tgt_ref,                        # [1, E]          i32  (edge_index[1])
    dist_ref,                       # [E, 2]          f32
    wd1_ref, bd1_ref,               # dist_mlp layer0: [2, HID], [1, HID]
    wd2t_ref, bd2_ref,              # dist_mlp layer1 (transposed): [1, HID], [1, 1]
    wa1_ref, ba1_ref,               # alpha_mlp layer0: [2, HID], [1, HID]
    wa2_ref, ba2_ref,               # alpha_mlp layer1: [HID, 3K], [1, 3K]
    wrbd_ref,                       # block-diag reduce: [NB*IN_CH, NB*HID]
    wop_ref, bop_ref,               # out_linear (padded): [(K+1)*HID, 128], [1, 128]
    out_ref,                        # [N, OUT_PAD]
):
    N = xcat_ref.shape[0]
    E = dist_ref.shape[0]

    # ---- dist_mlp(dist): Linear(2,H) -> SiLU -> Linear(H,1), per edge ----
    d0 = dist_ref[:, 0:1]           # [E, 1]
    d1 = dist_ref[:, 1:2]           # [E, 1]
    # (2-wide contraction decomposed into VPU broadcasts, no degenerate matmul)
    h = d0 * wd1_ref[0:1, :] + d1 * wd1_ref[1:2, :] + bd1_ref[...]     # [E, HID]
    h = h * jax.nn.sigmoid(h)                                          # SiLU
    # 1-lane-output matmul replaced by an XLU lane reduce (free slot here).
    de = jnp.sum(h * wd2t_ref[...], axis=-1, keepdims=True) + bd2_ref[...]   # [E, 1]

    # ---- scatter_mean(de, tgt) via one bf16 one-hot matmul -> (sums, counts) ----
    tgt = tgt_ref[...]                                                 # [1, E] int32
    node_ids = jax.lax.broadcasted_iota(jnp.int32, (N, E), 0)          # [N, E]
    mask = (node_ids == tgt).astype(jnp.bfloat16)                      # [N, E] (0/1 exact)
    rhs = jnp.concatenate(
        [de, jnp.ones((E, 1), jnp.float32)], axis=-1
    ).astype(jnp.bfloat16)                                             # [E, 2]
    sc = jnp.dot(mask, rhs, preferred_element_type=jnp.float32)        # [N, 2] = (sum, count)
    sums = sc[:, 0:1]
    counts = sc[:, 1:2]
    local_sim = jnp.where(counts > 0.0, sums / jnp.maximum(counts, 1.0), 0.0)  # [N, 1]

    # ---- alpha_mlp([ls, ls^2]): Linear(2,H) -> SiLU -> Linear(H,3K) ----
    ls = local_sim
    ls2 = local_sim * local_sim
    ha = ls * wa1_ref[0:1, :] + ls2 * wa1_ref[1:2, :] + ba1_ref[...]   # [N, HID]
    ha = ha * jax.nn.sigmoid(ha)
    alpha = jnp.dot(ha, wa2_ref[...], preferred_element_type=jnp.float32) + ba2_ref[...]  # [N, 3K]

    # ---- reduce (single layer): ONE block-diagonal matmul, then per-stack
    #      L2 normalize (dim=-1) -> ReLU on 32-wide slices of the dense slab ----
    red_all = jnp.dot(xcat_ref[...], wrbd_ref[...],
                      preferred_element_type=jnp.float32)              # [N, NB*HID]

    def l2norm(v):
        # v / max(||v||, EPS)  ==  v * rsqrt(max(sumsq, EPS^2))  (EUP, not VPU divide)
        ss = jnp.sum(v * v, axis=-1, keepdims=True)
        return v * jax.lax.rsqrt(jnp.maximum(ss, EPS * EPS))

    red = []
    for b in range(NB):                                     # static unroll (NB = 5)
        y = red_all[:, b * HID:(b + 1) * HID]                # [N, HID]
        red.append(jnp.maximum(l2norm(y), 0.0))

    x0 = red[0]                                              # x after reduce

    # ---- out = alpha_I * x + alpha_L * out_L + alpha_H * out_H, per k ----
    # alpha.reshape(N, K, 3): column 3k->I, 3k+1->L, 3k+2->H
    parts = [l2norm(x0) if OUT_NORM else x0]
    for k in range(K):                                       # static unroll
        a_i = alpha[:, 3 * k + 0: 3 * k + 1]                 # [N, 1]
        a_l = alpha[:, 3 * k + 1: 3 * k + 2]
        a_h = alpha[:, 3 * k + 2: 3 * k + 3]
        o_k = a_i * x0 + a_l * red[1 + k] + a_h * red[K + 1 + k]   # [N, HID]
        parts.append(l2norm(o_k) if OUT_NORM else o_k)

    # dropout: eval mode -> identity
    # permute(1,0,2).reshape(N,-1) == concat parts along feature dim
    feat = jnp.concatenate(parts, axis=-1)                   # [N, (K+1)*HID]

    # ---- out_linear (padded to 128 lanes -> unmasked, lane-dense stores) ----
    out_ref[...] = (
        jnp.dot(feat, wop_ref[...], preferred_element_type=jnp.float32) + bop_ref[...]
    )


# ------------------------------- wrapper ----------------------------------
def lsgnn_forward(xolh, tgt, dist, params):
    NB_, N, C = xolh.shape

    # lane-dense input slab: [N, NB*IN_CH]
    x_cat = jnp.transpose(xolh, (1, 0, 2)).reshape(N, NB_ * C)

    # block-diagonal reduce weight: [NB*IN_CH, NB*HID] (built once per call)
    eye = jnp.eye(NB_, dtype=params["wr"].dtype)
    wr_bd = jnp.einsum("bch,bd->bcdh", params["wr"], eye).reshape(NB_ * C, NB_ * HID)

    # dist_mlp second layer as a [1, HID] row (kernel does a lane reduce)
    wd2_t = params["wd2"].T

    # lane-dense out_linear: pad to 128 output columns with zeros
    wo_pad = jnp.zeros((FINAL_NZ * HID, OUT_PAD), jnp.float32).at[:, :OUT_CH].set(params["wo"])
    bo_pad = jnp.zeros((1, OUT_PAD), jnp.float32).at[:, :OUT_CH].set(params["bo"])

    args = (
        x_cat, tgt, dist,
        params["wd1"], params["bd1"], wd2_t, params["bd2"],
        params["wa1"], params["ba1"], params["wa2"], params["ba2"],
        wr_bd,
        wo_pad, bo_pad,
    )
    vmem = pl.BlockSpec(memory_space=pltpu.MemorySpace.VMEM)
    # TODO(synk): for large N/E, add a grid over N-tiles (dimension_semantics=
    #   ("parallel",) to use both v7x TensorCores) and tile the scatter over E
    #   as an inner "arbitrary" axis with pl.when-initialized accumulators;
    #   tile sizes must be re-derived against v7x's 64 MiB VMEM (the [TN,TE]
    #   mask tile dominates).  At these toy shapes everything fits in VMEM.
    out_pad = pl.pallas_call(
        lsgnn_kernel,
        out_shape=jax.ShapeDtypeStruct((N, OUT_PAD), jnp.float32),
        in_specs=[vmem] * len(args),
        out_specs=vmem,
    )(*args)
    return out_pad[:, :OUT_CH]


# --------------------------- pure-JAX reference ---------------------------
def lsgnn_reference(xolh, tgt, dist, params):
    N = xolh.shape[1]
    h = dist @ params["wd1"] + params["bd1"]
    h = h * jax.nn.sigmoid(h)
    de = (h @ params["wd2"] + params["bd2"]).reshape(-1)           # [E]
    tgt1 = tgt.reshape(-1)
    sums = jax.ops.segment_sum(de, tgt1, num_segments=N)
    counts = jax.ops.segment_sum(jnp.ones_like(de), tgt1, num_segments=N)
    local_sim = jnp.where(counts > 0, sums / jnp.maximum(counts, 1.0), 0.0)[:, None]
    ls2 = jnp.concatenate([local_sim, local_sim ** 2], axis=-1)
    ha = ls2 @ params["wa1"] + params["ba1"]
    ha = ha * jax.nn.sigmoid(ha)
    alpha = ha @ params["wa2"] + params["ba2"]                     # [N, 3K]

    def l2n(v):
        return v / jnp.maximum(jnp.sqrt(jnp.sum(v * v, -1, keepdims=True)), EPS)

    red = jnp.einsum("bnc,bch->bnh", xolh, params["wr"])
    red = jnp.maximum(l2n(red), 0.0)
    x0 = red[0]
    parts = [l2n(x0)]
    for k in range(K):
        o = (alpha[:, 3 * k:3 * k + 1] * x0
             + alpha[:, 3 * k + 1:3 * k + 2] * red[1 + k]
             + alpha[:, 3 * k + 2:3 * k + 3] * red[K + 1 + k])
        parts.append(l2n(o))
    feat = jnp.concatenate(parts, axis=-1)
    return feat @ params["wo"] + params["bo"]


# --------------------------------- main ------------------------------------
if __name__ == "__main__":
    N, E = 16, 64
    key = jax.random.PRNGKey(0)
    keys = jax.random.split(key, 16)

    # node features & graph
    x = jax.random.normal(keys[0], (N, IN_CH), jnp.float32)
    src = jax.random.randint(keys[1], (E,), 0, N, jnp.int32)
    tgt = jax.random.randint(keys[2], (E,), 0, N, jnp.int32)

    # dist = [cos-sim, cos-sim^2]  (method='cos'), as produced by LSGNN.dist()
    d = jnp.sum(x[src] * x[tgt], axis=-1)
    dist = jnp.stack([d, d * d], axis=-1).astype(jnp.float32)        # [E, 2]

    # x_out_L_out_H (output of prop(); synthetic input to forward())
    xolh = jax.random.normal(keys[3], (NB, N, IN_CH), jnp.float32)

    # deterministic synthetic parameters (linear weights stored [in, out])
    def xavier(k, shape, fan_in, fan_out):
        b = float(np.sqrt(6.0 / (fan_in + fan_out)))
        return jax.random.uniform(k, shape, jnp.float32, -b, b)

    params = {
        "wd1": xavier(keys[4], (2, HID), 2, HID),
        "bd1": jnp.zeros((1, HID), jnp.float32),
        "wd2": xavier(keys[5], (HID, 1), HID, 1),
        "bd2": jnp.zeros((1, 1), jnp.float32),
        "wa1": xavier(keys[6], (2, HID), 2, HID),
        "ba1": jnp.zeros((1, HID), jnp.float32),
        "wa2": xavier(keys[7], (HID, 3 * K), HID, 3 * K),
        "ba2": jnp.zeros((1, 3 * K), jnp.float32),
        "wr": xavier(keys[8], (NB, IN_CH, HID), IN_CH * HID, NB * HID),
        "wo": xavier(keys[9], (FINAL_NZ * HID, OUT_CH), FINAL_NZ * HID, OUT_CH),
        "bo": jnp.zeros((1, OUT_CH), jnp.float32),
    }

    tgt2d = tgt.reshape(1, E)

    out = lsgnn_forward(xolh, tgt2d, dist, params)
    out = jax.block_until_ready(out)

    ref = lsgnn_reference(xolh, tgt2d, dist, params)
    np.testing.assert_allclose(np.asarray(out), np.asarray(ref), rtol=2e-2, atol=2e-2)

    print("KERNEL_OK")
</pallas_src>

<mosaic_0001>
module attributes {stable_mosaic.version = 11 : i64} {
  func.func @lsgnn_kernel(%arg0: memref<16x40xf32, #tpu.memory_space<vmem>>, %arg1: memref<1x64xi32, #tpu.memory_space<vmem>>, %arg2: memref<64x2xf32, #tpu.memory_space<vmem>>, %arg3: memref<2x32xf32, #tpu.memory_space<vmem>>, %arg4: memref<1x32xf32, #tpu.memory_space<vmem>>, %arg5: memref<1x32xf32, #tpu.memory_space<vmem>>, %arg6: memref<1x1xf32, #tpu.memory_space<vmem>>, %arg7: memref<2x32xf32, #tpu.memory_space<vmem>>, %arg8: memref<1x32xf32, #tpu.memory_space<vmem>>, %arg9: memref<32x6xf32, #tpu.memory_space<vmem>>, %arg10: memref<1x6xf32, #tpu.memory_space<vmem>>, %arg11: memref<40x160xf32, #tpu.memory_space<vmem>>, %arg12: memref<96x128xf32, #tpu.memory_space<vmem>>, %arg13: memref<1x128xf32, #tpu.memory_space<vmem>>, %arg14: memref<16x128xf32, #tpu.memory_space<vmem>>) attributes {dimension_semantics = [], scalar_prefetch = 0 : i64, scratch_operands = 0 : i64, tpu.core_type = #tpu.core_type<tc>} {
    %c0 = arith.constant 0 : index
    %c0_0 = arith.constant 0 : index
    %0 = vector.load %arg2[%c0, %c0_0] : memref<64x2xf32, #tpu.memory_space<vmem>>, vector<64x1xf32>
    %c0_1 = arith.constant 0 : index
    %c1 = arith.constant 1 : index
    %1 = vector.load %arg2[%c0_1, %c1] : memref<64x2xf32, #tpu.memory_space<vmem>>, vector<64x1xf32>
    %c0_2 = arith.constant 0 : index
    %c0_3 = arith.constant 0 : index
    %2 = vector.load %arg3[%c0_2, %c0_3] : memref<2x32xf32, #tpu.memory_space<vmem>>, vector<1x32xf32>
    %3 = vector.broadcast %0 : vector<64x1xf32> to vector<64x32xf32>
    %4 = vector.broadcast %2 : vector<1x32xf32> to vector<64x32xf32>
    %5 = arith.mulf %3, %4 : vector<64x32xf32>
    %c1_4 = arith.constant 1 : index
    %c0_5 = arith.constant 0 : index
    %6 = vector.load %arg3[%c1_4, %c0_5] : memref<2x32xf32, #tpu.memory_space<vmem>>, vector<1x32xf32>
    %7 = vector.broadcast %1 : vector<64x1xf32> to vector<64x32xf32>
    %8 = vector.broadcast %6 : vector<1x32xf32> to vector<64x32xf32>
    %9 = arith.mulf %7, %8 : vector<64x32xf32>
    %10 = arith.addf %5, %9 : vector<64x32xf32>
    %c0_6 = arith.constant 0 : index
    %c0_7 = arith.constant 0 : index
    %11 = vector.load %arg4[%c0_6, %c0_7] : memref<1x32xf32, #tpu.memory_space<vmem>>, vector<1x32xf32>
    %12 = vector.broadcast %11 : vector<1x32xf32> to vector<64x32xf32>
    %13 = arith.addf %10, %12 : vector<64x32xf32>
    %14 = arith.negf %13 : vector<64x32xf32>
    %15 = math.exp %14 : vector<64x32xf32>
    %cst = arith.constant 1.000000e+00 : f32
    %16 = vector.broadcast %cst : f32 to vector<64x32xf32>
    %17 = arith.addf %16, %15 : vector<64x32xf32>
    %18 = arith.divf %16, %17 : vector<64x32xf32>
    %19 = arith.mulf %13, %18 : vector<64x32xf32>
    %c0_8 = arith.constant 0 : index
    %c0_9 = arith.constant 0 : index
    %20 = vector.load %arg5[%c0_8, %c0_9] : memref<1x32xf32, #tpu.memory_space<vmem>>, vector<1x32xf32>
    %21 = vector.broadcast %20 : vector<1x32xf32> to vector<64x32xf32>
    %22 = arith.mulf %19, %21 : vector<64x32xf32>
    %cst_10 = arith.constant dense<0.000000e+00> : vector<64xf32>
    %23 = vector.multi_reduction <add>, %22, %cst_10 [1] : vector<64x32xf32> to vector<64xf32>
    %24 = vector.shape_cast %23 : vector<64xf32> to vector<64x1xf32>
    %c0_11 = arith.constant 0 : index
    %c0_12 = arith.constant 0 : index
    %25 = vector.load %arg6[%c0_11, %c0_12] : memref<1x1xf32, #tpu.memory_space<vmem>>, vector<1x1xf32>
    %26 = vector.broadcast %25 : vector<1x1xf32> to vector<64x1xf32>
    %27 = arith.addf %24, %26 : vector<64x1xf32>
    %c0_13 = arith.constant 0 : index
    %c0_14 = arith.constant 0 : index
    %28 = vector.load %arg1[%c0_13, %c0_14] : memref<1x64xi32, #tpu.memory_space<vmem>>, vector<1x64xi32>
    %29 = tpu.iota {dimensions = array<i32: 0>} : vector<16x64xi32>
    %30 = vector.broadcast %28 : vector<1x64xi32> to vector<16x64xi32>
    %31 = arith.cmpi eq, %29, %30 : vector<16x64xi32>
    %32 = arith.extui %31 : vector<16x64xi1> to vector<16x64xi32>
    %33 = arith.sitofp %32 : vector<16x64xi32> to vector<16x64xf32>
    %34 = arith.truncf %33 : vector<16x64xf32> to vector<16x64xbf16>
    %cst_15 = arith.constant 1.000000e+00 : f32
    %35 = vector.broadcast %cst_15 : f32 to vector<64x1xf32>
    %36 = tpu.concatenate %27, %35 in 1 : vector<64x1xf32>, vector<64x1xf32> -> vector<64x2xf32>
    %37 = arith.truncf %36 : vector<64x2xf32> to vector<64x2xbf16>
    %cst_16 = arith.constant dense<0.000000e+00> : vector<16x2xf32>
    %38 = tpu.matmul %34, %37, %cst_16 {dimension_numbers = #tpu.dot_dimension_numbers<[1], [0], [0], [1], [0, 0, 1, 1], [], []>} : vector<16x64xbf16>, vector<64x2xbf16>, vector<16x2xf32> -> vector<16x2xf32>
    %39 = vector.extract_strided_slice %38 {offsets = [0, 0], sizes = [16, 1], strides = [1, 1]} : vector<16x2xf32> to vector<16x1xf32>
    %40 = vector.extract_strided_slice %38 {offsets = [0, 1], sizes = [16, 1], strides = [1, 1]} : vector<16x2xf32> to vector<16x1xf32>
    %cst_17 = arith.constant 0.000000e+00 : f32
    %41 = vector.broadcast %cst_17 : f32 to vector<16x1xf32>
    %42 = arith.cmpf ogt, %40, %41 : vector<16x1xf32>
    %cst_18 = arith.constant 1.000000e+00 : f32
    %43 = vector.broadcast %cst_18 : f32 to vector<16x1xf32>
    %44 = arith.maximumf %40, %43 : vector<16x1xf32>
    %45 = arith.divf %39, %44 : vector<16x1xf32>
    %cst_19 = arith.constant 0.000000e+00 : f32
    %46 = vector.broadcast %cst_19 : f32 to vector<16x1xf32>
    %47 = arith.select %42, %45, %46 : vector<16x1xi1>, vector<16x1xf32>
    %48 = arith.mulf %47, %47 : vector<16x1xf32>
    %c0_20 = arith.constant 0 : index
    %c0_21 = arith.constant 0 : index
    %49 = vector.load %arg7[%c0_20, %c0_21] : memref<2x32xf32, #tpu.memory_space<vmem>>, vector<1x32xf32>
    %50 = vector.broadcast %47 : vector<16x1xf32> to vector<16x32xf32>
    %51 = vector.broadcast %49 : vector<1x32xf32> to vector<16x32xf32>
    %52 = arith.mulf %50, %51 : vector<16x32xf32>
    %c1_22 = arith.constant 1 : index
    %c0_23 = arith.constant 0 : index
    %53 = vector.load %arg7[%c1_22, %c0_23] : memref<2x32xf32, #tpu.memory_space<vmem>>, vector<1x32xf32>
    %54 = vector.broadcast %48 : vector<16x1xf32> to vector<16x32xf32>
    %55 = vector.broadcast %53 : vector<1x32xf32> to vector<16x32xf32>
    %56 = arith.mulf %54, %55 : vector<16x32xf32>
    %57 = arith.addf %52, %56 : vector<16x32xf32>
    %c0_24 = arith.constant 0 : index
    %c0_25 = arith.constant 0 : index
    %58 = vector.load %arg8[%c0_24, %c0_25] : memref<1x32xf32, #tpu.memory_space<vmem>>, vector<1x32xf32>
    %59 = vector.broadcast %58 : vector<1x32xf32> to vector<16x32xf32>
    %60 = arith.addf %57, %59 : vector<16x32xf32>
    %61 = arith.negf %60 : vector<16x32xf32>
    %62 = math.exp %61 : vector<16x32xf32>
    %cst_26 = arith.constant 1.000000e+00 : f32
    %63 = vector.broadcast %cst_26 : f32 to vector<16x32xf32>
    %64 = arith.addf %63, %62 : vector<16x32xf32>
    %65 = arith.divf %63, %64 : vector<16x32xf32>
    %66 = arith.mulf %60, %65 : vector<16x32xf32>
    %c0_27 = arith.constant 0 : index
    %c0_28 = arith.constant 0 : index
    %67 = vector.load %arg9[%c0_27, %c0_28] : memref<32x6xf32, #tpu.memory_space<vmem>>, vector<32x6xf32>
    %cst_29 = arith.constant dense<0.000000e+00> : vector<16x6xf32>
    %68 = tpu.matmul %66, %67, %cst_29 {dimension_numbers = #tpu.dot_dimension_numbers<[1], [0], [0], [1], [0, 0, 1, 1], [], []>} : vector<16x32xf32>, vector<32x6xf32>, vector<16x6xf32> -> vector<16x6xf32>
    %c0_30 = arith.constant 0 : index
    %c0_31 = arith.constant 0 : index
    %69 = vector.load %arg10[%c0_30, %c0_31] : memref<1x6xf32, #tpu.memory_space<vmem>>, vector<1x6xf32>
    %70 = vector.broadcast %69 : vector<1x6xf32> to vector<16x6xf32>
    %71 = arith.addf %68, %70 : vector<16x6xf32>
    %c0_32 = arith.constant 0 : index
    %c0_33 = arith.constant 0 : index
    %72 = vector.load %arg0[%c0_32, %c0_33] : memref<16x40xf32, #tpu.memory_space<vmem>>, vector<16x40xf32>
    %c0_34 = arith.constant 0 : index
    %c0_35 = arith.constant 0 : index
    %73 = vector.load %arg11[%c0_34, %c0_35] : memref<40x160xf32, #tpu.memory_space<vmem>>, vector<40x160xf32>
    %cst_36 = arith.constant dense<0.000000e+00> : vector<16x160xf32>
    %74 = tpu.matmul %72, %73, %cst_36 {dimension_numbers = #tpu.dot_dimension_numbers<[1], [0], [0], [1], [0, 0, 1, 1], [], []>} : vector<16x40xf32>, vector<40x160xf32>, vector<16x160xf32> -> vector<16x160xf32>
    %75 = vector.extract_strided_slice %74 {offsets = [0, 0], sizes = [16, 32], strides = [1, 1]} : vector<16x160xf32> to vector<16x32xf32>
    %76 = arith.mulf %75, %75 : vector<16x32xf32>
    %cst_37 = arith.constant dense<0.000000e+00> : vector<16xf32>
    %77 = vector.multi_reduction <add>, %76, %cst_37 [1] : vector<16x32xf32> to vector<16xf32>
    %78 = vector.shape_cast %77 : vector<16xf32> to vector<16x1xf32>
    %cst_38 = arith.constant 1.000000e-24 : f32
    %79 = vector.broadcast %cst_38 : f32 to vector<16x1xf32>
    %80 = arith.maximumf %78, %79 : vector<16x1xf32>
    %81 = math.rsqrt %80 : vector<16x1xf32>
    %82 = vector.broadcast %81 : vector<16x1xf32> to vector<16x32xf32>
    %83 = arith.mulf %75, %82 : vector<16x32xf32>
    %cst_39 = arith.constant 0.000000e+00 : f32
    %84 = vector.broadcast %cst_39 : f32 to vector<16x32xf32>
    %85 = arith.maximumf %83, %84 : vector<16x32xf32>
    %86 = vector.extract_strided_slice %74 {offsets = [0, 32], sizes = [16, 32], strides = [1, 1]} : vector<16x160xf32> to vector<16x32xf32>
    %87 = arith.mulf %86, %86 : vector<16x32xf32>
    %cst_40 = arith.constant dense<0.000000e+00> : vector<16xf32>
    %88 = vector.multi_reduction <add>, %87, %cst_40 [1] : vector<16x32xf32> to vector<16xf32>
    %89 = vector.shape_cast %88 : vector<16xf32> to vector<16x1xf32>
    %cst_41 = arith.constant 1.000000e-24 : f32
    %90 = vector.broadcast %cst_41 : f32 to vector<16x1xf32>
    %91 = arith.maximumf %89, %90 : vector<16x1xf32>
    %92 = math.rsqrt %91 : vector<16x1xf32>
    %93 = vector.broadcast %92 : vector<16x1xf32> to vector<16x32xf32>
    %94 = arith.mulf %86, %93 : vector<16x32xf32>
    %cst_42 = arith.constant 0.000000e+00 : f32
    %95 = vector.broadcast %cst_42 : f32 to vector<16x32xf32>
    %96 = arith.maximumf %94, %95 : vector<16x32xf32>
    %97 = vector.extract_strided_slice %74 {offsets = [0, 64], sizes = [16, 32], strides = [1, 1]} : vector<16x160xf32> to vector<16x32xf32>
    %98 = arith.mulf %97, %97 : vector<16x32xf32>
    %cst_43 = arith.constant dense<0.000000e+00> : vector<16xf32>
    %99 = vector.multi_reduction <add>, %98, %cst_43 [1] : vector<16x32xf32> to vector<16xf32>
    %100 = vector.shape_cast %99 : vector<16xf32> to vector<16x1xf32>
    %cst_44 = arith.constant 1.000000e-24 : f32
    %101 = vector.broadcast %cst_44 : f32 to vector<16x1xf32>
    %102 = arith.maximumf %100, %101 : vector<16x1xf32>
    %103 = math.rsqrt %102 : vector<16x1xf32>
    %104 = vector.broadcast %103 : vector<16x1xf32> to vector<16x32xf32>
    %105 = arith.mulf %97, %104 : vector<16x32xf32>
    %cst_45 = arith.constant 0.000000e+00 : f32
    %106 = vector.broadcast %cst_45 : f32 to vector<16x32xf32>
    %107 = arith.maximumf %105, %106 : vector<16x32xf32>
    %108 = vector.extract_strided_slice %74 {offsets = [0, 96], sizes = [16, 32], strides = [1, 1]} : vector<16x160xf32> to vector<16x32xf32>
    %109 = arith.mulf %108, %108 : vector<16x32xf32>
    %cst_46 = arith.constant dense<0.000000e+00> : vector<16xf32>
    %110 = vector.multi_reduction <add>, %109, %cst_46 [1] : vector<16x32xf32> to vector<16xf32>
    %111 = vector.shape_cast %110 : vector<16xf32> to vector<16x1xf32>
    %cst_47 = arith.constant 1.000000e-24 : f32
    %112 = vector.broadcast %cst_47 : f32 to vector<16x1xf32>
    %113 = arith.maximumf %111, %112 : vector<16x1xf32>
    %114 = math.rsqrt %113 : vector<16x1xf32>
    %115 = vector.broadcast %114 : vector<16x1xf32> to vector<16x32xf32>
    %116 = arith.mulf %108, %115 : vector<16x32xf32>
    %cst_48 = arith.constant 0.000000e+00 : f32
    %117 = vector.broadcast %cst_48 : f32 to vector<16x32xf32>
    %118 = arith.maximumf %116, %117 : vector<16x32xf32>
    %119 = vector.extract_strided_slice %74 {offsets = [0, 128], sizes = [16, 32], strides = [1, 1]} : vector<16x160xf32> to vector<16x32xf32>
    %120 = arith.mulf %119, %119 : vector<16x32xf32>
    %cst_49 = arith.constant dense<0.000000e+00> : vector<16xf32>
    %121 = vector.multi_reduction <add>, %120, %cst_49 [1] : vector<16x32xf32> to vector<16xf32>
    %122 = vector.shape_cast %121 : vector<16xf32> to vector<16x1xf32>
    %cst_50 = arith.constant 1.000000e-24 : f32
    %123 = vector.broadcast %cst_50 : f32 to vector<16x1xf32>
    %124 = arith.maximumf %122, %123 : vector<16x1xf32>
    %125 = math.rsqrt %124 : vector<16x1xf32>
    %126 = vector.broadcast %125 : vector<16x1xf32> to vector<16x32xf32>
    %127 = arith.mulf %119, %126 : vector<16x32xf32>
    %cst_51 = arith.constant 0.000000e+00 : f32
    %128 = vector.broadcast %cst_51 : f32 to vector<16x32xf32>
    %129 = arith.maximumf %127, %128 : vector<16x32xf32>
    %130 = arith.mulf %85, %85 : vector<16x32xf32>
    %cst_52 = arith.constant dense<0.000000e+00> : vector<16xf32>
    %131 = vector.multi_reduction <add>, %130, %cst_52 [1] : vector<16x32xf32> to vector<16xf32>
    %132 = vector.shape_cast %131 : vector<16xf32> to vector<16x1xf32>
    %cst_53 = arith.constant 1.000000e-24 : f32
    %133 = vector.broadcast %cst_53 : f32 to vector<16x1xf32>
    %134 = arith.maximumf %132, %133 : vector<16x1xf32>
    %135 = math.rsqrt %134 : vector<16x1xf32>
    %136 = vector.broadcast %135 : vector<16x1xf32> to vector<16x32xf32>
    %137 = arith.mulf %85, %136 : vector<16x32xf32>
    %138 = vector.extract_strided_slice %71 {offsets = [0, 0], sizes = [16, 1], strides = [1, 1]} : vector<16x6xf32> to vector<16x1xf32>
    %139 = vector.extract_strided_slice %71 {offsets = [0, 1], sizes = [16, 1], strides = [1, 1]} : vector<16x6xf32> to vector<16x1xf32>
    %140 = vector.extract_strided_slice %71 {offsets = [0, 2], sizes = [16, 1], strides = [1, 1]} : vector<16x6xf32> to vector<16x1xf32>
    %141 = vector.broadcast %138 : vector<16x1xf32> to vector<16x32xf32>
    %142 = arith.mulf %141, %85 : vector<16x32xf32>
    %143 = vector.broadcast %139 : vector<16x1xf32> to vector<16x32xf32>
    %144 = arith.mulf %143, %96 : vector<16x32xf32>
    %145 = arith.addf %142, %144 : vector<16x32xf32>
    %146 = vector.broadcast %140 : vector<16x1xf32> to vector<16x32xf32>
    %147 = arith.mulf %146, %118 : vector<16x32xf32>
    %148 = arith.addf %145, %147 : vector<16x32xf32>
    %149 = arith.mulf %148, %148 : vector<16x32xf32>
    %cst_54 = arith.constant dense<0.000000e+00> : vector<16xf32>
    %150 = vector.multi_reduction <add>, %149, %cst_54 [1] : vector<16x32xf32> to vector<16xf32>
    %151 = vector.shape_cast %150 : vector<16xf32> to vector<16x1xf32>
    %cst_55 = arith.constant 1.000000e-24 : f32
    %152 = vector.broadcast %cst_55 : f32 to vector<16x1xf32>
    %153 = arith.maximumf %151, %152 : vector<16x1xf32>
    %154 = math.rsqrt %153 : vector<16x1xf32>
    %155 = vector.broadcast %154 : vector<16x1xf32> to vector<16x32xf32>
    %156 = arith.mulf %148, %155 : vector<16x32xf32>
    %157 = vector.extract_strided_slice %71 {offsets = [0, 3], sizes = [16, 1], strides = [1, 1]} : vector<16x6xf32> to vector<16x1xf32>
    %158 = vector.extract_strided_slice %71 {offsets = [0, 4], sizes = [16, 1], strides = [1, 1]} : vector<16x6xf32> to vector<16x1xf32>
    %159 = vector.extract_strided_slice %71 {offsets = [0, 5], sizes = [16, 1], strides = [1, 1]} : vector<16x6xf32> to vector<16x1xf32>
    %160 = vector.broadcast %157 : vector<16x1xf32> to vector<16x32xf32>
    %161 = arith.mulf %160, %85 : vector<16x32xf32>
    %162 = vector.broadcast %158 : vector<16x1xf32> to vector<16x32xf32>
    %163 = arith.mulf %162, %107 : vector<16x32xf32>
    %164 = arith.addf %161, %163 : vector<16x32xf32>
    %165 = vector.broadcast %159 : vector<16x1xf32> to vector<16x32xf32>
    %166 = arith.mulf %165, %129 : vector<16x32xf32>
    %167 = arith.addf %164, %166 : vector<16x32xf32>
    %168 = arith.mulf %167, %167 : vector<16x32xf32>
    %cst_56 = arith.constant dense<0.000000e+00> : vector<16xf32>
    %169 = vector.multi_reduction <add>, %168, %cst_56 [1] : vector<16x32xf32> to vector<16xf32>
    %170 = vector.shape_cast %169 : vector<16xf32> to vector<16x1xf32>
    %cst_57 = arith.constant 1.000000e-24 : f32
    %171 = vector.broadcast %cst_57 : f32 to vector<16x1xf32>
    %172 = arith.maximumf %170, %171 : vector<16x1xf32>
    %173 = math.rsqrt %172 : vector<16x1xf32>
    %174 = vector.broadcast %173 : vector<16x1xf32> to vector<16x32xf32>
    %175 = arith.mulf %167, %174 : vector<16x32xf32>
    %176 = tpu.concatenate %137, %156, %175 in 1 : vector<16x32xf32>, vector<16x32xf32>, vector<16x32xf32> -> vector<16x96xf32>
    %c0_58 = arith.constant 0 : index
    %c0_59 = arith.constant 0 : index
    %177 = vector.load %arg12[%c0_58, %c0_59] : memref<96x128xf32, #tpu.memory_space<vmem>>, vector<96x128xf32>
    %cst_60 = arith.constant dense<0.000000e+00> : vector<16x128xf32>
    %178 = tpu.matmul %176, %177, %cst_60 {dimension_numbers = #tpu.dot_dimension_numbers<[1], [0], [0], [1], [0, 0, 1, 1], [], []>} : vector<16x96xf32>, vector<96x128xf32>, vector<16x128xf32> -> vector<16x128xf32>
    %c0_61 = arith.constant 0 : index
    %c0_62 = arith.constant 0 : index
    %179 = vector.load %arg13[%c0_61, %c0_62] : memref<1x128xf32, #tpu.memory_space<vmem>>, vector<1x128xf32>
    %180 = vector.broadcast %179 : vector<1x128xf32> to vector<16x128xf32>
    %181 = arith.addf %178, %180 : vector<16x128xf32>
    %c0_63 = arith.constant 0 : index
    %c0_64 = arith.constant 0 : index
    %182 = vector.load %arg14[%c0_63, %c0_64] : memref<16x128xf32, #tpu.memory_space<vmem>>, vector<16x128xf32>
    tpu.vector_store %arg14[%c0_63, %c0_64], %181 {strides = array<i32>} : memref<16x128xf32, #tpu.memory_space<vmem>>, vector<16x128xf32>,
    return
  }
}

</mosaic_0001>

<bundles_post_ra>
// kernel: tpu_custom_call.1
= control target key start
LH: loop header
LB: loop body
LE: loop exit
PB: predicated region body
PF: predicated region fallthrough
CT: control target
= control target key end

     0   :  { %s1751_s0 = inlined_call_operand.vmem [shape: f32[16,40], index: 0, kind: input, shape index: {}]   ;;  %s1752_s1 = inlined_call_operand.vmem [shape: s32[1,64], index: 1, kind: input, shape index: {}]   ;;  %s1753_s2 = inlined_call_operand.vmem [shape: f32[64,2], index: 2, kind: input, shape index: {}]   ;;  %s1754_s3 = inlined_call_operand.vmem [shape: f32[2,32], index: 3, kind: input, shape index: {}]   ;;  %s1755_s4 = inlined_call_operand.vmem [shape: f32[1,32], index: 4, kind: input, shape index: {}]   ;;  %s1756_s5 = inlined_call_operand.vmem [shape: f32[1,32], index: 5, kind: input, shape index: {}]   ;;  %s1757_s6 = inlined_call_operand.<no memory space> [shape: f32[1,1], index: 6, kind: input, shape index: {}]   ;;  %s1758_s7 = inlined_call_operand.vmem [shape: f32[2,32], index: 7, kind: input, shape index: {}]   ;;  %s1759_s8 = inlined_call_operand.vmem [shape: f32[1,32], index: 8, kind: input, shape index: {}]   ;;  %s1760_s9 = inlined_call_operand.vmem [shape: f32[32,6], index: 9, kind: input, shape index: {}]   ;;  %s1761_s10 = inlined_call_operand.vmem [shape: f32[1,6], index: 10, kind: input, shape index: {}]   ;;  %s1762_s11 = inlined_call_operand.hbm [shape: f32[40,160], index: 11, kind: input, shape index: {}]   ;;  %s1763_s12 = inlined_call_operand.vmem [shape: f32[96,128], index: 12, kind: input, shape index: {}]   ;;  %s1764_s13 = inlined_call_operand.vmem [shape: f32[1,128], index: 13, kind: input, shape index: {}]   ;;  %s1765_s14 = inlined_call_operand.hbm [shape: f32[16,128], index: 14, kind: output, shape index: {}]  }
   0x1   :  { %v19_v0 = vstv %s1757_s6 }
   0x2   :  { %20 = vst [vmem:[#allocation2] sm:$0x1] %v19_v0 }
   0x3   :  { %21 = vsyncpa [#allocation4], 0 }
   0x4   :  { %22 = vsyncpa [#allocation5], 0  ;;  %s1333_s15 = smov [#allocation3]   ;;  %s1285_s19 = scalar_lea.hbm %s1762_s11, 1280 }
   0x5   :  { %s50_s16 = sshll.u32 %s1333_s15, 4  ;;  %p1286_p0 = scmp.ne.s32.totalorder %s1762_s11, %s1285_s19  ;;  %s51_s16 = int_to_ptr.vmem [resolvable:$true] %s50_s16 }
   0x6   :  { %p1289_p1 = scmp.lt.u32.totalorder %s1285_s19, %s1762_s11 }
   0x8   :  { %p1291_p2 = pnand %p1289_p1, %p1286_p0 }
   0xa   :  { %1294 = shalt.err (!%p1291_p2)
}
   0xb   :  { %s1295_s6 = scalar_lea.vmem %s51_s16, 1280  ;;  %p1300_p4 = scmp.lt.s32.totalorder %s51_s16, %s51_s16 }
   0xc   :  { %p1296_p3 = scmp.ne.s32.totalorder %s51_s16, %s1295_s6  ;;  %p1301_p5 = scmp.lt.s32.totalorder %s1295_s6, %s1295_s6 }
   0xe   :  { %p1302_p6 = por %p1301_p5, %p1300_p4 }
  0x10   :  { %p1303_p7 = pnand %p1302_p6, %p1296_p3 }
  0x12   :  { %1306 = shalt.err (!%p1303_p7)
}
  0x13   :  { %s1334_s24 = smov 256   ;;  %s1335_s25 = smov 16  }
  0x14   :  { %56 = dma.hbm_to_vmem [thread:$0]  %s1762_s11, 1280, %s51_s16, [#allocation4], %s1334_s24, %s1334_s24, %s1335_s25  }
  0x15   :  { %1329 = dma.done.wait [#allocation4], 1280  }
  0x16   :  { %1330 = vsyncadd [#allocation4], 4294966016  ;;  %v1336_v1 = vmov 1   ;;  %v1337_v2 = vmov 0   ;;  %v65_v3 = vld [vmem:[%s1753_s2] sm:$0xff]  ;;  %v66_v4 = vld [vmem:[%s1753_s2 + $0x8] sm:$0xff] }
  0x17   :  { %1188 = vset.pattern.permute.xlu1 %v1336_v1  ;;  %1187 = vset.pattern.permute.xlu0 %v1337_v2  ;;  %v67_v5 = vld [vmem:[%s1753_s2 + $0x10] sm:$0xff]  ;;  %v68_v6 = vld [vmem:[%s1753_s2 + $0x18] sm:$0xff]  ;;  %v70_v7 = vld [vmem:[%s1753_s2 + $0x28] sm:$0xff]  ;;  %vm265_vm0 = vcmask 261120   ;;  %vm1339_vm1 = vmmov 0   ;;  %vm320_vm2 = vcmask 7168  }
  0x18   :  { %128 = vperm.xlu1 %1188, %v65_v3   ;;  %76 = vperm.xlu0 %1187, %v65_v3   ;;  %v69_v8 = vld [vmem:[%s1753_s2 + $0x20] sm:$0xff]  ;;  %v71_v9 = vld [vmem:[%s1753_s2 + $0x30] sm:$0xff]  ;;  %v72_v10 = vld [vmem:[%s1753_s2 + $0x38] sm:$0xff]  ;;  %vm333_vm5 = vcmask 523264   ;;  %vm569_vm6 = vcmask 326656   ;;  %s1340_s16 = smov 127  }
  0x19   :  { %v1474_v11 = vld [vmem:[%s1754_s3 + $0x1] ss:$0 sm:$0xff]  ;;  %v1479_v12 = vld [vmem:[%s1754_s3] ss:$0 sm:$0xff]  ;;  %s1342_s19 = smov 96   ;;  %s1343_s20 = smov 64  }
  0x1a   :  { %v1486_v17 = vld [vmem:[%s1755_s4] ss:$0 sm:$0xff]  ;;  %s1344_s21 = smov 32   ;;  %vm922_vm9 = vcmask 785408  }
  0x1c   :  { %132 = vperm.xlu1 %1188, %v66_v4   ;;  %1190 = vset.pattern.permute.xlu0 %v1336_v1 }
  0x1d   :  { %136 = vperm.xlu0 %1190, %v67_v5  }
  0x20   :  { %1189 = vset.pattern.permute.xlu1 %v1337_v2 }
  0x21   :  { %91 = vperm.xlu1 %1189, %v68_v6   ;;  %1191 = vset.pattern.permute.xlu0 %v1337_v2 }
  0x22   :  { %81 = vperm.xlu0 %1191, %v66_v4  }
  0x25   :  { %1192 = vset.pattern.permute.xlu1 %v1336_v1 }
  0x26   :  { %140 = vperm.xlu1 %1192, %v68_v6   ;;  %86 = vperm.xlu0 %1191, %v67_v5  }
  0x2a   :  { %1193 = vset.pattern.permute.xlu1 %v1337_v2  ;;  %101 = vperm.xlu0 %1191, %v70_v7  }
  0x2b   :  { %96 = vperm.xlu1 %1193, %v69_v8  }
  0x2e   :  { %106 = vperm.xlu0 %1191, %v71_v9  }
  0x2f   :  { %1194 = vset.pattern.permute.xlu1 %v1336_v1 }
  0x30   :  { %144 = vperm.xlu1 %1194, %v69_v8  }
  0x32   :  { %1196 = vset.pattern.permute.xlu0 %v1336_v1 }
  0x33   :  { %152 = vperm.xlu0 %1196, %v71_v9  }
  0x34   :  { %148 = vperm.xlu1 %1194, %v70_v7  }
  0x38   :  { %1195 = vset.pattern.permute.xlu1 %v1337_v2 }
  0x39   :  { %111 = vperm.xlu1 %1195, %v72_v10  }
  0x3d   :  { %1197 = vset.pattern.permute.xlu1 %v1336_v1  ;;  %v1518_v1 = vld [vmem:[%s1756_s5] ss:$0 sm:$0xff] }
  0x3e   :  { %156 = vperm.xlu1 %1197, %v72_v10  }
  0x97   :  { %v129_v13 = vpop.permute.xlu1 %128  ;;  %v77_v14 = vpop.permute.xlu0 %76 }
  0x98   :  { %v163_v15 = vmul.f32 %v1474_v11, %v129_v13  ;;  %v118_v16 = vmul.f32 %v1479_v12, %v77_v14 }
  0x9a   :  { %v171_v18 = vadd.f32 %v163_v15, %v118_v16 }
  0x9b   :  { %v133_v19 = vpop.permute.xlu1 %132 }
  0x9c   :  { %v186_v20 = vadd.f32 %v1486_v17, %v171_v18  ;;  %v137_v21 = vpop.permute.xlu0 %136  ;;  %v164_v25 = vmul.f32 %v1474_v11, %v133_v19 }
  0x9d   :  { %v165_v27 = vmul.f32 %v1474_v11, %v137_v21 }
  0x9e   :  { %v1026_v22 = vmul.f32 -1.442695, %v186_v20 }
  0xa0   :  { %1209 = vpow2.f32 %v1026_v22  ;;  %v92_v23 = vpop.permute.xlu1 %91 }
  0xa1   :  { %v82_v24 = vpop.permute.xlu0 %81  ;;  %v121_v31 = vmul.f32 %v1479_v12, %v92_v23 }
  0xa2   :  { %v119_v26 = vmul.f32 %v1479_v12, %v82_v24 }
  0xa4   :  { %v172_v28 = vadd.f32 %v164_v25, %v119_v26 }
  0xa5   :  { %v141_v29 = vpop.permute.xlu1 %140  ;;  %v87_v30 = vpop.permute.xlu0 %86 }
  0xa6   :  { %v1494_v32 = vadd.f32 %v1486_v17, %v172_v28  ;;  %v166_v33 = vmul.f32 %v1474_v11, %v141_v29  ;;  %v120_v34 = vmul.f32 %v1479_v12, %v87_v30 }
  0xa8   :  { %v1027_v35 = vmul.f32 -1.442695, %v1494_v32  ;;  %v174_v36 = vadd.f32 %v166_v33, %v121_v31  ;;  %v173_v37 = vadd.f32 %v165_v27, %v120_v34 }
  0xa9   :  { %v102_v38 = vpop.permute.xlu0 %101 }
  0xaa   :  { %v1210_v39 = vpop.eup %1209  ;;  %1211 = vpow2.f32 %v1027_v35  ;;  %v1500_v40 = vadd.f32 %v1486_v17, %v174_v36  ;;  %v1503_v41 = vadd.f32 %v1486_v17, %v173_v37  ;;  %v97_v42 = vpop.permute.xlu1 %96  ;;  %v123_v56 = vmul.f32 %v1479_v12, %v102_v38 }
  0xab   :  { %v218_v43 = vadd.f32 1.0, %v1210_v39  ;;  %v122_v48 = vmul.f32 %v1479_v12, %v97_v42 }
  0xac   :  { %v1029_v44 = vmul.f32 -1.442695, %v1500_v40  ;;  %v1028_v45 = vmul.f32 -1.442695, %v1503_v41 }
  0xad   :  { %1213 = vrcp.f32 %v218_v43  ;;  %v107_v46 = vpop.permute.xlu0 %106 }
  0xae   :  { %1215 = vpow2.f32 %v1029_v44  ;;  %v124_v52 = vmul.f32 %v1479_v12, %v107_v46 }
  0xaf   :  { %1217 = vpow2.f32 %v1028_v45  ;;  %v145_v47 = vpop.permute.xlu1 %144 }
  0xb0   :  { %v167_v49 = vmul.f32 %v1474_v11, %v145_v47 }
  0xb2   :  { %v175_v50 = vadd.f32 %v167_v49, %v122_v48  ;;  %v153_v51 = vpop.permute.xlu0 %152 }
  0xb3   :  { %v169_v53 = vmul.f32 %v1474_v11, %v153_v51  ;;  %v149_v54 = vpop.permute.xlu1 %148 }
  0xb4   :  { %v1212_v55 = vpop.eup %1211  ;;  %v190_v57 = vadd.f32 %v1486_v17, %v175_v50  ;;  %v168_v58 = vmul.f32 %v1474_v11, %v149_v54 }
  0xb5   :  { %v219_v59 = vadd.f32 1.0, %v1212_v55  ;;  %v177_v60 = vadd.f32 %v169_v53, %v124_v52  ;;  %v1338_v52 = vmov 0.0  }
  0xb6   :  { %v1030_v61 = vmul.f32 -1.442695, %v190_v57  ;;  %v176_v62 = vadd.f32 %v168_v58, %v123_v56  ;;  %1078 = vmatprep.subr.bf16.mxu1 %v1338_v52  ;;  %1086 = vmatprep.mubr.msk.bf16.mxu1 %vm1339_vm1, %v1338_v52 }
  0xb7   :  { %v1214_v63 = vpop.eup %1213  ;;  %1219 = vrcp.f32 %v219_v59  ;;  %v192_v0 = vadd.f32 %v1486_v17, %v177_v60 }
  0xb8   :  { %v1216_v3 = vpop.eup %1215  ;;  %1221 = vpow2.f32 %v1030_v61  ;;  %v191_v4 = vadd.f32 %v1486_v17, %v176_v62  ;;  %v112_v5 = vpop.permute.xlu1 %111  ;;  %v242_v6 = vmul.f32 %v1214_v63, %v186_v20 }
  0xb9   :  { %v1218_v7 = vpop.eup %1217  ;;  %v221_v8 = vadd.f32 1.0, %v1216_v3  ;;  %v1032_v9 = vmul.f32 -1.442695, %v192_v0  ;;  %v125_v18 = vmul.f32 %v1479_v12, %v112_v5 }
  0xba   :  { %v220_v10 = vadd.f32 1.0, %v1218_v7  ;;  %v1031_v13 = vmul.f32 -1.442695, %v191_v4  ;;  %v257_v14 = vmul.f32 %v1518_v1, %v242_v6 }
  0xbb   :  { %1223 = vrcp.f32 %v221_v8 }
  0xbc   :  { %1225 = vrcp.f32 %v220_v10  ;;  %v266_v15 = vsel %vm265_vm0, %v257_v14, 0.0 }
  0xbd   :  { %1227 = vpow2.f32 %v1032_v9  ;;  %v157_v16 = vpop.permute.xlu1 %156  ;;  %267 = vadd.xlane.f32.xlu1 %v266_v15  ;;  %v306_v9 = vlaneseq }
  0xbe   :  { %1229 = vpow2.f32 %v1031_v13  ;;  %v170_v19 = vmul.f32 %v1474_v11, %v157_v16 }
  0xbf   :  { %v307_v14 = vshrl.u32 %v306_v9, 7  ;;  %v467_v9 = vld [vmem:[%s1760_s9 + $0x10] sm:$0xff] }
  0xc0   :  { %v178_v20 = vadd.f32 %v170_v19, %v125_v18 }
  0xc1   :  { %v1220_v21 = vpop.eup %1219 }
  0xc2   :  { %v1222_v22 = vpop.eup %1221  ;;  %v193_v23 = vadd.f32 %v1486_v17, %v178_v20  ;;  %v243_v24 = vmul.f32 %v1220_v21, %v1494_v32  ;;  %v308_v20 = vadd.s32 8, %v307_v14 }
  0xc3   :  { %v222_v25 = vadd.f32 1.0, %v1222_v22 }
  0xc4   :  { %v1033_v26 = vmul.f32 -1.442695, %v193_v23  ;;  %v258_v27 = vmul.f32 %v1518_v1, %v243_v24 }
  0xc5   :  { %v1224_v28 = vpop.eup %1223  ;;  %1231 = vrcp.f32 %v222_v25 }
  0xc6   :  { %v1226_v29 = vpop.eup %1225  ;;  %1233 = vpow2.f32 %v1033_v26  ;;  %v269_v30 = vsel %vm265_vm0, %v258_v27, 0.0  ;;  %v245_v12 = vmul.f32 %v1224_v28, %v1500_v40 }
  0xc7   :  { %v1228_v11 = vpop.eup %1227  ;;  %270 = vadd.xlane.f32.xlu0 %v269_v30  ;;  %v244_v31 = vmul.f32 %v1226_v29, %v1503_v41 }
  0xc8   :  { %v1230_v33 = vpop.eup %1229  ;;  %v224_v17 = vadd.f32 1.0, %v1228_v11  ;;  %v260_v32 = vmul.f32 %v1518_v1, %v245_v12 }
  0xc9   :  { %v223_v34 = vadd.f32 1.0, %v1230_v33  ;;  %v259_v35 = vmul.f32 %v1518_v1, %v244_v31  ;;  %v560_v31 = vld [vmem:[#allocation3 + $0x8] sm:$0xff]  ;;  %v562_v33 = vld [vmem:[#allocation3 + $0x18] sm:$0xff] }
  0xca   :  { %1235 = vrcp.f32 %v224_v17  ;;  %v275_v36 = vsel %vm265_vm0, %v260_v32, 0.0  ;;  %v559_v17 = vld [vmem:[#allocation3] sm:$0xff]  ;;  %v1136_v32 = vpack.c.bf16 %v562_v33, %v560_v31 }
  0xcb   :  { %1237 = vrcp.f32 %v223_v34  ;;  %276 = vadd.xlane.f32.xlu1 %v275_v36  ;;  %v272_v37 = vsel %vm265_vm0, %v259_v35, 0.0  ;;  %v561_v34 = vld [vmem:[#allocation3 + $0x10] sm:$0xff]  ;;  %v564_v35 = vld [vmem:[#allocation3 + $0x28] sm:$0xff]  ;;  %v566_v36 = vld [vmem:[#allocation3 + $0x38] sm:$0xff] }
  0xcc   :  { %273 = vadd.xlane.f32.xlu0 %v272_v37  ;;  %v1138_v37 = vpack.c.bf16 %v561_v34, %v559_v17 }
  0xcf   :  { %v1232_v38 = vpop.eup %1231 }
  0xd0   :  { %v1234_v39 = vpop.eup %1233  ;;  %v246_v40 = vmul.f32 %v1232_v38, %v190_v57  ;;  %v1035_v57 = vld [vmem:[#allocation2] ss:$0 sm:$0xff]  ;;  %v1140_v38 = vpack.c.bf16 %v566_v36, %v564_v35 }
  0xd1   :  { %v225_v42 = vadd.f32 1.0, %v1234_v39  ;;  %v563_v39 = vld [vmem:[#allocation3 + $0x20] sm:$0xff] }
  0xd2   :  { %v261_v41 = vmul.f32 %v1518_v1, %v246_v40  ;;  %v565_v40 = vld [vmem:[#allocation3 + $0x30] sm:$0xff] }
  0xd3   :  { %1239 = vrcp.f32 %v225_v42  ;;  %v1142_v42 = vpack.c.bf16 %v565_v40, %v563_v39 }
  0xd4   :  { %v1236_v43 = vpop.eup %1235  ;;  %v278_v44 = vsel %vm265_vm0, %v261_v41, 0.0  ;;  %v568_v41 = vld [vmem:[#allocation3 + $0x48] sm:$0xff] }
  0xd5   :  { %v1238_v45 = vpop.eup %1237  ;;  %279 = vadd.xlane.f32.xlu0 %v278_v44  ;;  %v248_v46 = vmul.f32 %v1236_v43, %v192_v0  ;;  %v567_v43 = vld [vmem:[#allocation3 + $0x40] sm:$0xff] }
  0xd6   :  { %v247_v47 = vmul.f32 %v1238_v45, %v191_v4  ;;  %v557_v44 = vld [vmem:[%s1751_s0] sm:$0xff]  ;;  %v558_v45 = vld [vmem:[%s1751_s0 + $0x8] sm:$0xff]  ;;  %s1341_s0 = smov 1  }
  0xd7   :  { %v263_v48 = vmul.f32 %v1518_v1, %v248_v46 }
  0xd8   :  { %v262_v49 = vmul.f32 %v1518_v1, %v247_v47 }
  0xd9   :  { %v284_v50 = vsel %vm265_vm0, %v263_v48, 0.0 }
  0xda   :  { %v281_v51 = vsel %vm265_vm0, %v262_v49, 0.0  ;;  %285 = vadd.xlane.f32.xlu0 %v284_v50 }
  0xdb   :  { %282 = vadd.xlane.f32.xlu1 %v281_v51 }
  0xdd   :  { %v1240_v53 = vpop.eup %1239 }
  0xde   :  { %v249_v54 = vmul.f32 %v1240_v53, %v193_v23  ;;  %v1036_v23 = vld [vmem:[%s1752_s1] ss:$0 sm:$0xff] }
  0xdf   :  { %vm313_vm3 = vcmp.eq.s32.totalorder %v307_v14, %v1036_v23  ;;  %vm314_vm4 = vcmp.eq.s32.totalorder %v308_v20, %v1036_v23  ;;  %v1042_v23 = vld [vmem:[%s1759_s8] ss:$0 sm:$0xff] }
  0xe0   :  { %v264_v55 = vmul.f32 %v1518_v1, %v249_v54  ;;  %v1037_v27 = vsel %vm313_vm3, 1.0, %v1338_v52  ;;  %v1038_v28 = vsel %vm314_vm4, 1.0, %v1338_v52 }
  0xe1   :  { %v319_v11 = vpack.c.bf16 %v1038_v28, %v1037_v27 }
  0xe2   :  { %v287_v56 = vsel %vm265_vm0, %v264_v55, 0.0 }
  0xe3   :  { %288 = vadd.xlane.f32.xlu1 %v287_v56 }
 0x14a   :  { %v268_v58 = vpop.xlane.xlu1 %267 }
 0x14b   :  { %v297_v59 = vadd.f32 %v1035_v57, %v268_v58 }
 0x14d   :  { %v321_v62 = vsel %vm320_vm2, %v297_v59, 1.0 }
 0x154   :  { %v271_v60 = vpop.xlane.xlu0 %270 }
 0x155   :  { %v298_v61 = vadd.f32 %v1035_v57, %v271_v60 }
 0x157   :  { %v322_v63 = vsel %vm320_vm2, %v298_v61, 1.0 }
 0x158   :  { %v277_v0 = vpop.xlane.xlu1 %276  ;;  %v329_v3 = vpack.c.bf16 %v322_v63, %v321_v62 }
 0x159   :  { %v300_v4 = vadd.f32 %v1035_v57, %v277_v0  ;;  %v274_v1 = vpop.xlane.xlu0 %273 }
 0x15a   :  { %v299_v5 = vadd.f32 %v1035_v57, %v274_v1  ;;  %1079 = vmatpush3.bf16.msra.mxu1 %v329_v3 }
 0x15b   :  { %v324_v6 = vsel %vm320_vm2, %v300_v4, 1.0  ;;  %1080 = vmatprep.subr.bf16.mxu1 %v1338_v52 }
 0x15c   :  { %v323_v7 = vsel %vm320_vm2, %v299_v5, 1.0 }
 0x15d   :  { %v330_v8 = vpack.c.bf16 %v324_v6, %v323_v7  ;;  %v465_v6 = vld [vmem:[%s1760_s9] sm:$0xff]  ;;  %v466_v7 = vld [vmem:[%s1760_s9 + $0x8] sm:$0xff] }
 0x15f   :  { %1081 = vmatpush3.bf16.msra.mxu1 %v330_v8  ;;  %v1128_v8 = vpack.c.bf16 %v466_v7, %v465_v6 }
 0x160   :  { %1082 = vmatprep.subr.bf16.mxu1 %v1338_v52 }
 0x161   :  { %1129 = vmatprep.subr.bf16.mxu0 %v1128_v8 }
 0x162   :  { %v280_v10 = vpop.xlane.xlu0 %279  ;;  %1131 = vmatpush3.bf16.msra.mxu0 %v1128_v8 }
 0x163   :  { %v301_v13 = vadd.f32 %v1035_v57, %v280_v10  ;;  %v468_v10 = vld [vmem:[%s1760_s9 + $0x18] sm:$0xff] }
 0x165   :  { %v325_v18 = vsel %vm320_vm2, %v301_v13, 1.0  ;;  %v1132_v13 = vpack.c.bf16 %v468_v10, %v467_v9 }
 0x167   :  { %v286_v22 = vpop.xlane.xlu0 %285  ;;  %1133 = vmatprep.subr.bf16.mxu0 %v1132_v13 }
 0x168   :  { %v283_v15 = vpop.xlane.xlu1 %282  ;;  %v303_v24 = vadd.f32 %v1035_v57, %v286_v22  ;;  %1135 = vmatpush3.bf16.msra.mxu0 %v1132_v13 }
 0x169   :  { %v302_v16 = vadd.f32 %v1035_v57, %v283_v15  ;;  %v1040_v15 = vld [vmem:[%s1758_s7] ss:$0 sm:$0xff] }
 0x16a   :  { %v327_v29 = vsel %vm320_vm2, %v303_v24, 1.0 }
 0x16b   :  { %v326_v19 = vsel %vm320_vm2, %v302_v16, 1.0 }
 0x16c   :  { %v331_v21 = vpack.c.bf16 %v326_v19, %v325_v18  ;;  %v1041_v18 = vld [vmem:[%s1758_s7 + $0x1] ss:$0 sm:$0xff] }
 0x16e   :  { %1083 = vmatpush3.bf16.msra.mxu1 %v331_v21 }
 0x16f   :  { %1084 = vmatprep.subr.bf16.mxu1 %v1338_v52 }
 0x170   :  { %v289_v25 = vpop.xlane.xlu1 %288 }
 0x171   :  { %v304_v26 = vadd.f32 %v1035_v57, %v289_v25 }
 0x173   :  { %v328_v30 = vsel %vm320_vm2, %v304_v26, 1.0 }
 0x174   :  { %v332_v12 = vpack.c.bf16 %v328_v30, %v327_v29 }
 0x176   :  { %1085 = vmatpush3.bf16.msra.mxu1 %v332_v12 }
 0x177   :  { %1137 = vmatprep.subr.bf16.mxu1 %v1136_v32 }
 0x179   :  { %1087 = vmatmul.mubr.msk.bf16.vlgmr.msra.gmra.mrb[0].mxu1 %vm333_vm5, %v319_v11 }
 0x17a   :  { %640 = vmatprep.mubr.f32.mxu1 %v1338_v52  ;;  %1139 = vmatpush1.bf16.msra.mxu1 %v1138_v37 }
 0x17b   :  { %1141 = vmatprep.subr.bf16.mxu1 %v1140_v38 }
 0x17e   :  { %1143 = vmatpush1.bf16.msra.mxu1 %v1142_v42 }
 0x17f   :  { %584 = vmatprep.subr.mxu1 %v568_v41 }
 0x182   :  { %585 = vmatpush1.msra.mxu1 %v567_v43 }
 0x183   :  { %1048 = vmatmul.mubr.msk.f32.vlgmr.msra.gmra.mrb[4].mxu1 %vm569_vm6, %v557_v44 }
 0x184   :  { %646 = vmatprep.mubr.f32.mxu1 %v1338_v52 }
 0x187   :  { %1049 = vmatmul.mubr.msk.f32.gmra.mrb[6].mxu1 %vm569_vm6, %v558_v45 }
 0x24c   :  { %v371_v46 = vpop.f32.mrb[0].mxu1 }
 0x24d   :  { %v380_v47 = vmax.f32 %v371_v46, 1.0  ;;  %v1088_v48 = vpop.f32.mrb[1].mxu1  ;;  %vm378_vm7 = vcmp.gt.f32.partialorder %v371_v46, 0.0 }
 0x24e   :  { %v374_v49 = vpop.f32.mrb[2].mxu1 }
 0x24f   :  { %v381_v50 = vmax.f32 %v374_v49, 1.0  ;;  %384 = vrot.lane.b32.xlu0 %v380_v47, %s1340_s16  ;;  %v1089_v51 = vpop.f32.mrb[3].mxu1  ;;  %vm379_vm8 = vcmp.gt.f32.partialorder %v374_v49, 0.0 }
 0x250   :  { %v1045_v51 = vld [vmem:[%s1761_s10] ss:$0 sm:$0xff] }
 0x251   :  { %386 = vrot.lane.b32.xlu1 %v381_v50, %s1340_s16 }
 0x256   :  { %v1570_v55 = vpop.f32.mrb[4].mxu1 }
 0x257   :  { %v1572_v52 = vpop.f32.mrb[5].mxu1  ;;  %v653_v1 = vmul.f32 %v1570_v55, %v1570_v55 }
 0x259   :  { %v655_v43 = vsel %vm265_vm0, %v653_v1, 0.0 }
 0x25a   :  { %v1574_v56 = vpop.f32.mrb[6].mxu1 }
 0x25b   :  { %v1580_v5 = vmul.f32 %v1574_v56, %v1574_v56  ;;  %v1603_v14 = vpop.f32.mrb[7].mxu1 }
 0x2c1   :  { %v385_v53 = vpop.permute.xlu0 %384 }
 0x2c2   :  { %1241 = vrcp.f32 %v385_v53 }
 0x2c3   :  { %v387_v54 = vpop.permute.xlu1 %386 }
 0x2c4   :  { %1243 = vrcp.f32 %v387_v54 }
 0x2cc   :  { %v1242_v57 = vpop.eup %1241 }
 0x2cd   :  { %v391_v58 = vmul.f32 %v1242_v57, %v371_v46 }
 0x2ce   :  { %v1244_v59 = vpop.eup %1243 }
 0x2cf   :  { %396 = vrot.lane.b32.xlu1 %v391_v58, %s1341_s0  ;;  %v393_v60 = vmul.f32 %v1244_v59, %v374_v49  ;;  %v1345_v59 = vmov 4  }
 0x2d1   :  { %398 = vrot.lane.b32.xlu0 %v393_v60, %s1341_s0  ;;  %v1346_v60 = vmov 2  }
 0x341   :  { %v397_v61 = vpop.permute.xlu1 %396 }
 0x342   :  { %v402_v62 = vsel %vm378_vm7, %v397_v61, 0.0  ;;  %v1347_v61 = vmov 3  }
 0x343   :  { %v404_v63 = vmul.f32 %v402_v62, %v402_v62  ;;  %v399_v0 = vpop.permute.xlu0 %398  ;;  %409 = vperm.xlu1 %1197, %v402_v62   ;;  %v731_v62 = vmul.f32 %v1572_v52, %v1572_v52 }
 0x344   :  { %v403_v3 = vsel %vm379_vm8, %v399_v0, 0.0  ;;  %v658_v0 = vsel %vm265_vm0, %v1580_v5, 0.0 }
 0x345   :  { %426 = vperm.xlu0 %1196, %v404_v63   ;;  %v405_v4 = vmul.f32 %v403_v3, %v403_v3  ;;  %v733_v63 = vsel %vm265_vm0, %v731_v62, 0.0 }
 0x347   :  { %414 = vperm.xlu1 %1197, %v403_v3   ;;  %v1348_v3 = vmov 5  }
 0x349   :  { %431 = vperm.xlu0 %1196, %v405_v4   ;;  %v732_v4 = vmul.f32 %v1603_v14, %v1603_v14 }
 0x34b   :  { %671 = vrot.lane.b32.xlu1 %v653_v1, %s1342_s19 }
 0x34d   :  { %673 = vrot.lane.b32.xlu0 %v1580_v5, %s1342_s19 }
 0x34f   :  { %691 = vrot.lane.b32.xlu1 %v653_v1, %s1343_s20 }
 0x351   :  { %693 = vrot.lane.b32.xlu0 %v1580_v5, %s1343_s20 }
 0x353   :  { %711 = vrot.lane.b32.xlu1 %v653_v1, %s1344_s21  ;;  %v736_v1 = vsel %vm265_vm0, %v732_v4, 0.0 }
 0x355   :  { %713 = vrot.lane.b32.xlu0 %v1580_v5, %s1344_s21 }
 0x3c2   :  { %v410_v16 = vpop.permute.xlu1 %409 }
 0x3c3   :  { %v421_v20 = vmul.f32 %v1040_v15, %v410_v16 }
 0x3c4   :  { %v427_v19 = vpop.permute.xlu0 %426 }
 0x3c5   :  { %v438_v21 = vmul.f32 %v1041_v18, %v427_v19 }
 0x3c6   :  { %v415_v22 = vpop.permute.xlu1 %414 }
 0x3c7   :  { %v440_v24 = vadd.f32 %v438_v21, %v421_v20  ;;  %v422_v26 = vmul.f32 %v1040_v15, %v415_v22 }
 0x3c8   :  { %v432_v25 = vpop.permute.xlu0 %431 }
 0x3c9   :  { %v439_v27 = vmul.f32 %v1041_v18, %v432_v25  ;;  %v449_v28 = vadd.f32 %v1042_v23, %v440_v24 }
 0x3ca   :  { %v672_v29 = vpop.permute.xlu1 %671 }
 0x3cb   :  { %v441_v30 = vadd.f32 %v439_v27, %v422_v26  ;;  %v677_v12 = vsel %vm265_vm0, %v672_v29, 0.0  ;;  %v1043_v11 = vmul.f32 -1.442695, %v449_v28 }
 0x3cc   :  { %678 = vadd.xlane.f32.xlu1 %v677_v12  ;;  %v674_v31 = vpop.permute.xlu0 %673 }
 0x3cd   :  { %v450_v33 = vadd.f32 %v1042_v23, %v441_v30  ;;  %v680_v17 = vsel %vm265_vm0, %v674_v31, 0.0  ;;  %1245 = vpow2.f32 %v1043_v11 }
 0x3ce   :  { %681 = vadd.xlane.f32.xlu0 %v680_v17  ;;  %v692_v32 = vpop.permute.xlu1 %691 }
 0x3cf   :  { %v1044_v34 = vmul.f32 -1.442695, %v450_v33  ;;  %v697_v35 = vsel %vm265_vm0, %v692_v32, 0.0 }
 0x3d0   :  { %v694_v36 = vpop.permute.xlu0 %693 }
 0x3d1   :  { %1247 = vpow2.f32 %v1044_v34  ;;  %v700_v37 = vsel %vm265_vm0, %v694_v36, 0.0 }
 0x3d2   :  { %698 = vadd.xlane.f32.xlu0 %v697_v35  ;;  %701 = vadd.xlane.f32.xlu1 %v700_v37  ;;  %v712_v38 = vpop.permute.xlu1 %711 }
 0x3d3   :  { %v717_v39 = vsel %vm265_vm0, %v712_v38, 0.0 }
 0x3d4   :  { %v714_v40 = vpop.permute.xlu0 %713 }
 0x3d5   :  { %v720_v42 = vsel %vm265_vm0, %v714_v40, 0.0 }
 0x3d6   :  { %718 = vadd.xlane.f32.xlu0 %v717_v39  ;;  %721 = vadd.xlane.f32.xlu1 %v720_v42 }
 0x3d7   :  { %v1246_v41 = vpop.eup %1245 }
 0x3d8   :  { %v457_v44 = vadd.f32 1.0, %v1246_v41 }
 0x3da   :  { %656 = vadd.xlane.f32.xlu0 %v655_v43  ;;  %1249 = vrcp.f32 %v457_v44 }
 0x3db   :  { %v1248_v45 = vpop.eup %1247 }
 0x3dc   :  { %v458_v46 = vadd.f32 1.0, %v1248_v45 }
 0x3de   :  { %1251 = vrcp.f32 %v458_v46 }
 0x3e4   :  { %v1250_v47 = vpop.eup %1249 }
 0x3e5   :  { %v463_v48 = vmul.f32 %v1250_v47, %v449_v28 }
 0x3e7   :  { %1098 = vmatprep.mubr.msk.f32.mxu0 %vm265_vm0, %v463_v48 }
 0x3e8   :  { %v1252_v49 = vpop.eup %1251 }
 0x3e9   :  { %v464_v50 = vmul.f32 %v1252_v49, %v450_v33 }
 0x3eb   :  { %1099 = vmatmul.mubr.msk.f32.vlgmr.msra.gmra.mrb[0].mxu0 %vm265_vm0, %v464_v50 }
 0x459   :  { %v679_v6 = vpop.xlane.xlu1 %678 }
 0x45a   :  { %v683_v9 = vmax.f32 %v679_v6, 1e-24 }
 0x45b   :  { %v682_v5 = vpop.xlane.xlu0 %681 }
 0x45c   :  { %v684_v7 = vmax.f32 %v682_v5, 1e-24 }
 0x45e   :  { %1253 = vrsqrt.f32 %v684_v7 }
 0x45f   :  { %v702_v8 = vpop.xlane.xlu1 %701  ;;  %1255 = vrsqrt.f32 %v683_v9 }
 0x460   :  { %v704_v10 = vmax.f32 %v702_v8, 1e-24 }
 0x462   :  { %1257 = vrsqrt.f32 %v704_v10 }
 0x463   :  { %v722_v20 = vpop.xlane.xlu1 %721 }
 0x464   :  { %v724_v38 = vmax.f32 %v722_v20, 1e-24 }
 0x468   :  { %v1254_v13 = vpop.eup %1253 }
 0x469   :  { %v688_v18 = vmul.f32 %v1254_v13, %v1574_v56  ;;  %v1256_v19 = vpop.eup %1255 }
 0x46a   :  { %v687_v24 = vmul.f32 %v1256_v19, %v1570_v55 }
 0x46b   :  { %v690_v23 = vmax.f32 %v688_v18, 0.0 }
 0x46c   :  { %v1258_v21 = vpop.eup %1257  ;;  %v689_v29 = vmax.f32 %v687_v24, 0.0 }
 0x46d   :  { %v708_v26 = vmul.f32 %v1258_v21, %v1574_v56 }
 0x46f   :  { %v710_v30 = vmax.f32 %v708_v26, 0.0 }
 0x4be   :  { %v1100_v53 = vpop.f32.mrb[0].mxu0 }
 0x4bf   :  { %v554_v54 = vadd.f32 %v1100_v53, %v1045_v51  ;;  %v548_v57 = vpop.f32.mrb[1].mxu0 }
 0x4c0   :  { %v549_v58 = vadd.f32 %v1045_v51, %v548_v57 }
 0x4c1   :  { %778 = vperm.xlu1 %1197, %v554_v54  }
 0x4c2   :  { %774 = vperm.xlu0 %1196, %v549_v58  }
 0x4c5   :  { %1198 = vset.pattern.permute.xlu1 %v1345_v59 }
 0x4c6   :  { %842 = vperm.xlu1 %1198, %v554_v54   ;;  %1201 = vset.pattern.permute.xlu0 %v1346_v60 }
 0x4ca   :  { %1199 = vset.pattern.permute.xlu1 %v1346_v60 }
 0x4cb   :  { %798 = vperm.xlu1 %1199, %v554_v54  }
 0x4cf   :  { %1200 = vset.pattern.permute.xlu1 %v1345_v59 }
 0x4d0   :  { %838 = vperm.xlu1 %1200, %v549_v58  }
 0x4d4   :  { %1203 = vset.pattern.permute.xlu1 %v1347_v61 }
 0x4e1   :  { %734 = vadd.xlane.f32.xlu0 %v733_v63 }
 0x4f4   :  { %659 = vadd.xlane.f32.xlu1 %v658_v0 }
 0x4f7   :  { %794 = vperm.xlu0 %1201, %v549_v58  }
 0x4fb   :  { %1202 = vset.pattern.permute.xlu0 %v1337_v2 }
 0x505   :  { %832 = vperm.xlu1 %1203, %v554_v54  }
 0x509   :  { %1204 = vset.pattern.permute.xlu1 %v1348_v3 }
 0x50a   :  { %862 = vperm.xlu1 %1204, %v554_v54  }
 0x50e   :  { %1205 = vset.pattern.permute.xlu1 %v1337_v2  ;;  %v699_v2 = vpop.xlane.xlu0 %698 }
 0x50f   :  { %763 = vperm.xlu1 %1205, %v549_v58   ;;  %v703_v16 = vmax.f32 %v699_v2, 1e-24 }
 0x511   :  { %1259 = vrsqrt.f32 %v703_v16 }
 0x512   :  { %v719_v15 = vpop.xlane.xlu0 %718 }
 0x513   :  { %1206 = vset.pattern.permute.xlu1 %v1347_v61  ;;  %v723_v37 = vmax.f32 %v719_v15, 1e-24 }
 0x514   :  { %828 = vperm.xlu1 %1206, %v549_v58  }
 0x515   :  { %1261 = vrsqrt.f32 %v723_v37 }
 0x516   :  { %737 = vadd.xlane.f32.xlu0 %v736_v1  ;;  %v657_v22 = vpop.xlane.xlu0 %656  ;;  %1263 = vrsqrt.f32 %v724_v38 }
 0x517   :  { %v661_v59 = vmax.f32 %v657_v22, 1e-24 }
 0x518   :  { %1207 = vset.pattern.permute.xlu1 %v1348_v3 }
 0x519   :  { %858 = vperm.xlu1 %1207, %v549_v58  }
 0x51b   :  { %v1260_v33 = vpop.eup %1259 }
 0x51c   :  { %v707_v32 = vmul.f32 %v1260_v33, %v1570_v55 }
 0x51e   :  { %v709_v34 = vmax.f32 %v707_v32, 0.0 }
 0x51f   :  { %v1262_v39 = vpop.eup %1261 }
 0x520   :  { %v727_v41 = vmul.f32 %v1262_v39, %v1570_v55  ;;  %v1264_v43 = vpop.eup %1263 }
 0x521   :  { %v728_v44 = vmul.f32 %v1264_v43, %v1574_v56  ;;  %v905_v43 = vld [vmem:[%s1763_s12 + $0x10] sm:$0xff] }
 0x522   :  { %v729_v45 = vmax.f32 %v727_v41, 0.0  ;;  %v904_v41 = vld [vmem:[%s1763_s12 + $0x8] sm:$0xff] }
 0x523   :  { %v730_v48 = vmax.f32 %v728_v44, 0.0 }
 0x52c   :  { %768 = vperm.xlu0 %1202, %v554_v54  }
 0x530   :  { %1208 = vset.pattern.permute.xlu0 %v1348_v3 }
 0x540   :  { %v779_v25 = vpop.permute.xlu1 %778 }
 0x541   :  { %v782_v27 = vmul.f32 %v779_v25, %v690_v23  ;;  %v775_v28 = vpop.permute.xlu0 %774 }
 0x542   :  { %v781_v12 = vmul.f32 %v775_v28, %v689_v29 }
 0x543   :  { %787 = vrot.lane.b32.xlu1 %v782_v27, %s1342_s19 }
 0x545   :  { %v843_v11 = vpop.permute.xlu1 %842 }
 0x546   :  { %v846_v31 = vmul.f32 %v843_v11, %v710_v30 }
 0x547   :  { %785 = vrot.lane.b32.xlu1 %v781_v12, %s1342_s19 }
 0x548   :  { %851 = vrot.lane.b32.xlu0 %v846_v31, %s1343_s20 }
 0x54a   :  { %v799_v17 = vpop.permute.xlu1 %798 }
 0x54b   :  { %v802_v50 = vmul.f32 %v799_v17, %v730_v48  ;;  %v908_v48 = vld [vmem:[%s1763_s12 + $0x28] sm:$0xff] }
 0x54f   :  { %v839_v35 = vpop.permute.xlu1 %838 }
 0x550   :  { %v845_v36 = vmul.f32 %v839_v35, %v709_v34 }
 0x552   :  { %849 = vrot.lane.b32.xlu1 %v845_v36, %s1343_s20 }
 0x56e   :  { %v735_v40 = vpop.xlane.xlu0 %734 }
 0x56f   :  { %v739_v42 = vmax.f32 %v735_v40, 1e-24 }
 0x571   :  { %1265 = vrsqrt.f32 %v739_v42  ;;  %v903_v42 = vld [vmem:[%s1763_s12] sm:$0xff] }
 0x572   :  { %1267 = vrsqrt.f32 %v661_v59  ;;  %v1144_v44 = vpack.c.bf16 %v904_v41, %v903_v42  ;;  %v912_v59 = vld [vmem:[%s1763_s12 + $0x48] sm:$0xff] }
 0x574   :  { %1145 = vmatprep.subr.bf16.mxu0 %v1144_v44 }
 0x575   :  { %1147 = vmatpush3.bf16.msra.mxu0 %v1144_v44 }
 0x576   :  { %v795_v46 = vpop.permute.xlu0 %794 }
 0x577   :  { %v801_v47 = vmul.f32 %v795_v46, %v729_v45  ;;  %v906_v45 = vld [vmem:[%s1763_s12 + $0x18] sm:$0xff] }
 0x578   :  { %v1148_v46 = vpack.c.bf16 %v906_v45, %v905_v43 }
 0x579   :  { %805 = vrot.lane.b32.xlu1 %v801_v47, %s1344_s21  ;;  %v907_v47 = vld [vmem:[%s1763_s12 + $0x20] sm:$0xff] }
 0x57a   :  { %1149 = vmatprep.subr.bf16.mxu0 %v1148_v46 }
 0x57b   :  { %v1266_v49 = vpop.eup %1265  ;;  %1151 = vmatpush3.bf16.msra.mxu0 %v1148_v46 }
 0x57c   :  { %v743_v51 = vmul.f32 %v1266_v49, %v1572_v52  ;;  %v1268_v4 = vpop.eup %1267  ;;  %v1152_v49 = vpack.c.bf16 %v908_v48, %v907_v47 }
 0x57d   :  { %807 = vrot.lane.b32.xlu1 %v802_v50, %s1344_s21  ;;  %v665_v52 = vmul.f32 %v1268_v4, %v1570_v55  ;;  %v909_v50 = vld [vmem:[%s1763_s12 + $0x30] sm:$0xff]  ;;  %v914_v4 = vld [vmem:[%s1763_s12 + $0x58] sm:$0xff] }
 0x57e   :  { %v745_v18 = vmax.f32 %v743_v51, 0.0  ;;  %v910_v51 = vld [vmem:[%s1763_s12 + $0x38] sm:$0xff]  ;;  %1153 = vmatprep.subr.bf16.mxu0 %v1152_v49 }
 0x57f   :  { %v1651_v8 = vmax.f32 %v665_v52, 0.0  ;;  %1155 = vmatpush3.bf16.msra.mxu0 %v1152_v49 }
 0x581   :  { %v660_v53 = vpop.xlane.xlu1 %659  ;;  %v747_v35 = vmul.f32 %v1651_v8, %v1651_v8 }
 0x582   :  { %v662_v60 = vmax.f32 %v660_v53, 1e-24  ;;  %v1156_v53 = vpack.c.bf16 %v910_v51, %v909_v50 }
 0x583   :  { %v749_v37 = vsel %vm265_vm0, %v747_v35, 0.0 }
 0x584   :  { %1269 = vrsqrt.f32 %v662_v60  ;;  %1157 = vmatprep.subr.bf16.mxu0 %v1156_v53 }
 0x585   :  { %v833_v54 = vpop.permute.xlu1 %832  ;;  %1159 = vmatpush3.bf16.msra.mxu0 %v1156_v53 }
 0x589   :  { %v863_v57 = vpop.permute.xlu1 %862 }
 0x58e   :  { %v764_v58 = vpop.permute.xlu1 %763  ;;  %v1270_v1 = vpop.eup %1269 }
 0x58f   :  { %v666_v6 = vmul.f32 %v1270_v1, %v1574_v56  ;;  %v771_v16 = vmul.f32 %v764_v58, %v1651_v8  ;;  %v911_v58 = vld [vmem:[%s1763_s12 + $0x40] sm:$0xff] }
 0x591   :  { %v1653_v2 = vmax.f32 %v666_v6, 0.0 }
 0x593   :  { %v829_v61 = vpop.permute.xlu1 %828  ;;  %v836_v55 = vmul.f32 %v833_v54, %v1653_v2  ;;  %v748_v39 = vmul.f32 %v1653_v2, %v1653_v2 }
 0x594   :  { %v835_v13 = vmul.f32 %v829_v61, %v1651_v8 }
 0x595   :  { %v752_v40 = vsel %vm265_vm0, %v748_v39, 0.0 }
 0x598   :  { %v859_v0 = vpop.permute.xlu1 %858 }
 0x599   :  { %v865_v21 = vmul.f32 %v859_v0, %v745_v18 }
 0x5a3   :  { %v738_v62 = vpop.xlane.xlu0 %737 }
 0x5a4   :  { %v740_v63 = vmax.f32 %v738_v62, 1e-24  ;;  %v1160_v62 = vpack.c.bf16 %v912_v59, %v911_v58 }
 0x5a6   :  { %1271 = vrsqrt.f32 %v740_v63  ;;  %1161 = vmatprep.subr.bf16.mxu0 %v1160_v62 }
 0x5a7   :  { %1163 = vmatpush3.bf16.msra.mxu0 %v1160_v62 }
 0x5ab   :  { %v769_v9 = vpop.permute.xlu0 %768 }
 0x5ac   :  { %v772_v24 = vmul.f32 %v769_v9, %v1653_v2 }
 0x5b0   :  { %v1272_v7 = vpop.eup %1271 }
 0x5b1   :  { %v744_v15 = vmul.f32 %v1272_v7, %v1603_v14 }
 0x5b3   :  { %v746_v22 = vmax.f32 %v744_v15, 0.0 }
 0x5b5   :  { %v788_v3 = vpop.permute.xlu1 %787  ;;  %v866_v14 = vmul.f32 %v863_v57, %v746_v22 }
 0x5b6   :  { %v792_v28 = vadd.f32 %v788_v3, %v772_v24  ;;  %v913_v3 = vld [vmem:[%s1763_s12 + $0x50] sm:$0xff] }
 0x5b7   :  { %v1164_v52 = vpack.c.bf16 %v914_v4, %v913_v3 }
 0x5b9   :  { %v786_v5 = vpop.permute.xlu1 %785  ;;  %1165 = vmatprep.subr.bf16.mxu0 %v1164_v52 }
 0x5ba   :  { %v852_v20 = vpop.permute.xlu0 %851  ;;  %v791_v56 = vadd.f32 %v786_v5, %v771_v16  ;;  %1167 = vmatpush3.bf16.msra.mxu0 %v1164_v52 }
 0x5bb   :  { %v856_v25 = vadd.f32 %v852_v20, %v836_v55 }
 0x5bd   :  { %v1666_v12 = vadd.f32 %v866_v14, %v856_v25 }
 0x5bf   :  { %v870_v36 = vmul.f32 %v1666_v12, %v1666_v12 }
 0x5c1   :  { %v874_v38 = vsel %vm265_vm0, %v870_v36, 0.0 }
 0x5c4   :  { %v850_v10 = vpop.permute.xlu1 %849 }
 0x5c5   :  { %v855_v19 = vadd.f32 %v850_v10, %v835_v13 }
 0x5c7   :  { %v1660_v26 = vadd.f32 %v865_v21, %v855_v19 }
 0x5c9   :  { %v869_v33 = vmul.f32 %v1660_v26, %v1660_v26 }
 0x5cb   :  { %v871_v32 = vsel %vm265_vm0, %v869_v33, 0.0 }
 0x5eb   :  { %v806_v23 = vpop.permute.xlu1 %805 }
 0x5ec   :  { %v1662_v27 = vadd.f32 %v806_v23, %v791_v56 }
 0x5ee   :  { %v813_v29 = vmul.f32 %v1662_v27, %v1662_v27 }
 0x5ef   :  { %v808_v30 = vpop.permute.xlu1 %807 }
 0x5f0   :  { %v1668_v11 = vadd.f32 %v808_v30, %v792_v28  ;;  %v815_v31 = vsel %vm265_vm0, %v813_v29, 0.0 }
 0x5f1   :  { %816 = vadd.xlane.f32.xlu0 %v815_v31 }
 0x5f2   :  { %v814_v17 = vmul.f32 %v1668_v11, %v1668_v11 }
 0x5f4   :  { %v818_v34 = vsel %vm265_vm0, %v814_v17, 0.0 }
 0x5f5   :  { %872 = vadd.xlane.f32.xlu0 %v871_v32  ;;  %819 = vadd.xlane.f32.xlu1 %v818_v34 }
 0x5f9   :  { %750 = vadd.xlane.f32.xlu1 %v749_v37  ;;  %875 = vadd.xlane.f32.xlu0 %v874_v38 }
 0x5fd   :  { %753 = vadd.xlane.f32.xlu0 %v752_v40 }
 0x67e   :  { %v817_v54 = vpop.xlane.xlu0 %816 }
 0x67f   :  { %v821_v57 = vmax.f32 %v817_v54, 1e-24 }
 0x681   :  { %1273 = vrsqrt.f32 %v821_v57 }
 0x682   :  { %v820_v60 = vpop.xlane.xlu1 %819  ;;  %v873_v61 = vpop.xlane.xlu0 %872 }
 0x683   :  { %v822_v63 = vmax.f32 %v820_v60, 1e-24  ;;  %v877_v0 = vmax.f32 %v873_v61, 1e-24 }
 0x685   :  { %1275 = vrsqrt.f32 %v822_v63 }
 0x686   :  { %1277 = vrsqrt.f32 %v877_v0  ;;  %v876_v1 = vpop.xlane.xlu0 %875  ;;  %v751_v19 = vpop.xlane.xlu1 %750 }
 0x687   :  { %v878_v5 = vmax.f32 %v876_v1, 1e-24  ;;  %v755_v20 = vmax.f32 %v751_v19, 1e-24 }
 0x689   :  { %1279 = vrsqrt.f32 %v878_v5 }
 0x68a   :  { %v754_v55 = vpop.xlane.xlu0 %753  ;;  %1281 = vrsqrt.f32 %v755_v20 }
 0x68b   :  { %v1274_v6 = vpop.eup %1273  ;;  %v756_v21 = vmax.f32 %v754_v55, 1e-24 }
 0x68c   :  { %v825_v7 = vmul.f32 %v1274_v6, %v1662_v27 }
 0x68d   :  { %1283 = vrsqrt.f32 %v756_v21 }
 0x68e   :  { %885 = vrot.lane.b32.xlu1 %v825_v7, %s1344_s21 }
 0x68f   :  { %v1276_v9 = vpop.eup %1275 }
 0x690   :  { %v1278_v10 = vpop.eup %1277  ;;  %v826_v13 = vmul.f32 %v1276_v9, %v1668_v11 }
 0x691   :  { %v881_v15 = vmul.f32 %v1278_v10, %v1660_v26 }
 0x692   :  { %887 = vrot.lane.b32.xlu0 %v826_v13, %s1344_s21  ;;  %s1349_s21 = smov [#allocation6]  }
 0x693   :  { %893 = vrot.lane.b32.xlu1 %v881_v15, %s1343_s20  ;;  %v1280_v16 = vpop.eup %1279  ;;  %s1011_s7 = sshll.u32 %s1349_s21, 4  ;;  %s1012_s7 = int_to_ptr.vmem [resolvable:$true] %s1011_s7 }
 0x694   :  { %v882_v18 = vmul.f32 %v1280_v16, %v1666_v12  ;;  %v1282_v56 = vpop.eup %1281  ;;  %s1307_s8 = scalar_lea.vmem %s1012_s7, 256  ;;  %p1312_p9 = scmp.lt.s32.totalorder %s1012_s7, %s1012_s7 }
 0x695   :  { %v759_v23 = vmul.f32 %v1282_v56, %v1651_v8  ;;  %v1050_v8 = vld [vmem:[%s1764_s13] ss:$0 sm:$0xff]  ;;  %p1308_p8 = scmp.ne.s32.totalorder %s1012_s7, %s1307_s8  ;;  %p1313_p10 = scmp.lt.s32.totalorder %s1307_s8, %s1307_s8 }
 0x697   :  { %895 = vrot.lane.b32.xlu1 %v882_v18, %s1343_s20  ;;  %v1284_v24 = vpop.eup %1283  ;;  %p1314_p11 = por %p1313_p10, %p1312_p9 }
 0x698   :  { %v760_v14 = vmul.f32 %v1284_v24, %v1653_v2 }
 0x699   :  { %p1315_p12 = pnand %p1314_p11, %p1308_p8 }
 0x700   :  { %v886_v22 = vpop.permute.xlu1 %885 }
 0x701   :  { %v899_v25 = vsel %vm265_vm0, %v759_v23, %v886_v22 }
 0x704   :  { %v888_v28 = vpop.permute.xlu0 %887 }
 0x705   :  { %v894_v26 = vpop.permute.xlu1 %893  ;;  %v900_v29 = vsel %vm265_vm0, %v760_v14, %v888_v28 }
 0x706   :  { %v901_v27 = vsel %vm333_vm5, %v899_v25, %v894_v26 }
 0x707   :  { %1125 = vmatprep.mubr.msk.f32.mxu0 %vm922_vm9, %v901_v27 }
 0x709   :  { %v896_v30 = vpop.permute.xlu1 %895 }
 0x70a   :  { %v902_v12 = vsel %vm333_vm5, %v900_v29, %v896_v30 }
 0x70b   :  { %1126 = vmatmul.mubr.msk.f32.vlgmr.msra.gmra.mrb[2].mxu0 %vm922_vm9, %v902_v12 }
 0x7de   :  { %v1127_v11 = vpop.f32.mrb[2].mxu0 }
 0x7df   :  { %v1001_v31 = vadd.f32 %v1127_v11, %v1050_v8  ;;  %v995_v33 = vpop.f32.mrb[3].mxu0 }
 0x7e0   :  { %v996_v17 = vadd.f32 %v1050_v8, %v995_v33 }
 0x7e1   :  { %1005 = vst [vmem:[#allocation6 + $0x8] sm:$0xff] %v1001_v31 }
 0x7e2   :  { %1004 = vst [vmem:[#allocation6] sm:$0xff] %v996_v17 }
 0x7e3   :  { %1318 = shalt.err (!%p1315_p12)
}
 0x7e4   :  { %s1319_s13 = scalar_lea.hbm %s1765_s14, 256 }
 0x7e5   :  { %p1320_p13 = scmp.ne.s32.totalorder %s1765_s14, %s1319_s13  ;;  %p1323_p0 = scmp.lt.u32.totalorder %s1319_s13, %s1765_s14 }
 0x7e7   :  { %p1325_p1 = pnand %p1323_p0, %p1320_p13 }
 0x7e9   :  { %1328 = shalt.err (!%p1325_p1)
}
 0x7ea   :  { %s1350_s11 = smov 128   ;;  %s1351_s16 = smov 8  }
 0x7eb   :  { %1017 = dma.vmem_to_hbm [thread:$0]  %s1012_s7, 256, %s1765_s14, [#allocation5], %s1350_s11, %s1350_s11, %s1351_s16  }
 0x7ec   :  { %1331 = dma.done.wait [#allocation5], 256  }
 0x7ed   :  { %1332 = vsyncadd [#allocation5], 4294967040 }
 0x7ee   :  { %1021 = vsyncpa [#allocation4], 1 }
 0x7ef   :  { %1022 = vsyncpa [#allocation5], 1 }

</bundles_post_ra>
